<compile_context>
chip_gen: v7x
topology: tpu7x:2x2x1
jax: 0.10.0
libtpu: 0.0.40
codegen_flags: <defaults>
</compile_context>

<pallas_src>
import jax
import jax.numpy as jnp
from jax.experimental import pallas as pl
from jax.experimental.pallas import tpu as pltpu


def _self_attention_kernel(x_ref, w_ref, b_ref, o_ref):
    # x_ref: (TB*N, Din) f32    w_ref: (Din, 3*Dp) bf16
    # b_ref: (1, 3*Dp)   f32    o_ref: (TB, N, Dout) f32
    tb, n, dout = o_ref.shape
    dp = w_ref.shape[1] // 3

    # Fused QKV projection: bf16 operands, f32 accumulation on the MXU.
    xb = x_ref[...].astype(jnp.bfloat16)
    qkv = jnp.dot(xb, w_ref[...], preferred_element_type=jnp.float32)
    qkv = qkv + b_ref[...]                        # (TB*N, 3*Dp) f32
    qkv = qkv.reshape(tb, n, 3 * dp)              # N % 8 == 0 -> cheap split

    # 128-lane-aligned slices; cast to bf16 for the attention matmuls.
    q = qkv[:, :, 0 * dp:1 * dp].astype(jnp.bfloat16)
    k = qkv[:, :, 1 * dp:2 * dp].astype(jnp.bfloat16)
    v = qkv[:, :, 2 * dp:2 * dp + dout].astype(jnp.bfloat16)

    # Scores: contract last axes directly (no transposed copy of k).
    s = jnp.einsum("bqd,bkd->bqk", q, k, preferred_element_type=jnp.float32)

    # Numerically stable softmax over the last axis, kept in f32 (VPU/EUP).
    s = s - jnp.max(s, axis=-1, keepdims=True)
    p = jnp.exp(s)
    p = p * pl.reciprocal(jnp.sum(p, axis=-1, keepdims=True), approx=True)

    # out = att @ v  (bf16 operands, f32 accumulation).
    out = jnp.einsum("bqk,bkd->bqd", p.astype(jnp.bfloat16), v,
                     preferred_element_type=jnp.float32)
    o_ref[...] = out.astype(o_ref.dtype)


def _vmem_estimate_bytes(TB, N, Din, Dp, Dout):
    x_blk = 2 * TB * N * Din * 4        # double-buffered f32 x block
    w_blk = 1 * Din * 3 * Dp * 2        # single-buffered bf16 fused weights
    b_blk = 1 * 3 * Dp * 4              # single-buffered f32 bias
    o_blk = 2 * TB * N * Dout * 4       # double-buffered f32 output block
    qkv = TB * N * 3 * Dp * 4           # f32 projection intermediate
    scores = 2 * TB * N * N * 4         # s and p (f32) live together
    return x_blk + w_blk + b_blk + o_blk + qkv + scores


def self_attention(x, wq, bq, wk, bk, wv, bv, *, batch_block=None):
    """x: (B, N, Din) f32; w*: (Din, Dout); b*: (Dout,). Returns (B, N, Dout) f32."""
    B, N, Din = x.shape
    Dout = wq.shape[1]
    Dp = ((Dout + 127) // 128) * 128    # pad each Q/K/V section to 128 lanes

    # f32 sublane layout / cheap (TB*N, 3Dp)->(TB, N, 3Dp) reshape requires this.
    # TODO(synk): support N % 8 != 0 via padded keys + score masking.
    assert N % 8 == 0, "self_attention kernel requires N to be a multiple of 8"

    def pad_w(w):
        return jnp.pad(w, ((0, 0), (0, Dp - Dout)))

    def pad_b(b):
        return jnp.pad(b, ((0, Dp - Dout),))

    # Fused, lane-padded QKV weights (bf16 MXU operands; biases stay f32).
    w_qkv = jnp.concatenate([pad_w(wq), pad_w(wk), pad_w(wv)], axis=1)
    w_qkv = w_qkv.astype(jnp.bfloat16)                              # (Din, 3*Dp)
    b_qkv = jnp.concatenate([pad_b(bq), pad_b(bk), pad_b(bv)]).reshape(1, 3 * Dp)
    b_qkv = b_qkv.astype(jnp.float32)

    # x stays f32 here; the bf16 cast happens inside the kernel (VALU slack).
    x2 = x.reshape(B * N, Din)

    if batch_block is None:
        # Per-batch MXU flops: QKV projection + q@k^T + p@v.
        per_batch_flops = 2 * N * Din * 3 * Dp + 2 * N * N * Dp + 2 * N * N * Dout
        # Split across the two v7x TensorCores (grid >= 2, "parallel") only when
        # each half-batch step amortizes the ~0.35us per-step overhead; at toy
        # sizes and on single-TC v5e/v6e keep everything in one grid step.
        if B % 2 == 0 and (B // 2) * per_batch_flops >= 4_000_000:
            batch_block = B // 2
        else:
            batch_block = B
    assert B % batch_block == 0, "batch_block must divide B"
    TB = batch_block
    grid = (B // TB,)

    est = _vmem_estimate_bytes(TB, N, Din, Dp, Dout)
    if est > 48 * 2**20:
        # TODO(synk): flash-tile the (N, N) score matrix (extra KV grid axis
        # marked "arbitrary" + m/l/acc scratch) once the monolithic tile no
        # longer fits v7x's 64 MiB VMEM.
        raise NotImplementedError(
            "monolithic score tile too large for VMEM; reduce batch_block/N")
    vmem_limit = int(min(60 * 2**20, max(24 * 2**20, 2 * est)))

    out = pl.pallas_call(
        _self_attention_kernel,
        out_shape=jax.ShapeDtypeStruct((B, N, Dout), jnp.float32),
        grid=grid,
        in_specs=[
            # x rows of TB batches (f32; cast to bf16 in-kernel).
            pl.BlockSpec((TB * N, Din), lambda i: (i, 0)),
            # Constant-index weight/bias blocks: single-buffered (never change
            # across grid steps), halving their VMEM footprint.
            pl.BlockSpec((Din, 3 * Dp), lambda i: (0, 0),
                         pipeline_mode=pl.Buffered(1)),
            pl.BlockSpec((1, 3 * Dp), lambda i: (0, 0),
                         pipeline_mode=pl.Buffered(1)),
        ],
        # Exact-shape output: only useful bytes written, no wrapper slice pass.
        out_specs=pl.BlockSpec((TB, N, Dout), lambda i: (i, 0, 0)),
        compiler_params=pltpu.CompilerParams(
            dimension_semantics=("parallel",),
            vmem_limit_bytes=vmem_limit),
    )(x2, w_qkv, b_qkv)

    return out


def self_attention_ref(x, wq, bq, wk, bk, wv, bv):
    """Pure f32 reference matching the PyTorch module."""
    q = x @ wq + bq
    k = x @ wk + bk
    v = x @ wv + bv
    att = jax.nn.softmax(jnp.einsum("bnd,bmd->bnm", q, k), axis=-1)
    return jnp.einsum("bnm,bmd->bnd", att, v)


def self_attention_ref_emulated(x, wq, bq, wk, bk, wv, bv):
    """Reference mirroring the kernel's deliberate precision choices
    (bf16 MXU operands everywhere, f32 accumulation, f32 softmax)."""
    bf = jnp.bfloat16
    xb = x.astype(bf)

    def proj(w, b):
        return jnp.dot(xb, w.astype(bf), preferred_element_type=jnp.float32) + b

    q = proj(wq, bq).astype(bf)
    k = proj(wk, bk).astype(bf)
    v = proj(wv, bv).astype(bf)
    s = jnp.einsum("bqd,bkd->bqk", q, k, preferred_element_type=jnp.float32)
    p = jax.nn.softmax(s, axis=-1)
    return jnp.einsum("bqk,bkd->bqd", p.astype(bf), v,
                      preferred_element_type=jnp.float32)


if __name__ == "__main__":
    B, N, INP_DIM, OUT_DIM = 2, 8, 16, 32

    key = jax.random.PRNGKey(0)
    kx, kq, kbq, kk, kbk, kwv, kbv = jax.random.split(key, 7)

    x = jax.random.normal(kx, (B, N, INP_DIM), dtype=jnp.float32)

    # Deterministic init mimicking nn.Linear's uniform(-1/sqrt(in), 1/sqrt(in)).
    bound = 1.0 / (INP_DIM ** 0.5)
    wq = jax.random.uniform(kq, (INP_DIM, OUT_DIM), jnp.float32, -bound, bound)
    bq = jax.random.uniform(kbq, (OUT_DIM,), jnp.float32, -bound, bound)
    wk = jax.random.uniform(kk, (INP_DIM, OUT_DIM), jnp.float32, -bound, bound)
    bk = jax.random.uniform(kbk, (OUT_DIM,), jnp.float32, -bound, bound)
    wv = jax.random.uniform(kwv, (INP_DIM, OUT_DIM), jnp.float32, -bound, bound)
    bv = jax.random.uniform(kbv, (OUT_DIM,), jnp.float32, -bound, bound)

    out = self_attention(x, wq, bq, wk, bk, wv, bv)
    out = jax.block_until_ready(out)
    assert out.shape == (B, N, OUT_DIM)

    # Tight check vs a reference that applies the same bf16 operand rounding the
    # kernel uses (isolates kernel bugs from the deliberate precision choices;
    # remaining delta is the approx reciprocal + accumulation order).
    ref_emul = self_attention_ref_emulated(x, wq, bq, wk, bk, wv, bv)
    assert jnp.allclose(out, ref_emul, atol=1e-2, rtol=1e-2), \
        "mismatch vs bf16-operand emulated reference"

    # Sanity vs the pure-f32 reference at a bf16-appropriate tolerance.
    ref_f32 = self_attention_ref(x, wq, bq, wk, bk, wv, bv)
    assert jnp.allclose(out, ref_f32, atol=5e-2, rtol=5e-2), \
        "mismatch vs f32 reference"

    print("KERNEL_OK")
</pallas_src>

<mosaic_0001>
module attributes {stable_mosaic.version = 11 : i64} {
  func.func @_self_attention_kernel(%arg0: i32, %arg1: memref<16x16xf32, #tpu.memory_space<vmem>>, %arg2: memref<16x384xbf16, #tpu.memory_space<vmem>>, %arg3: memref<1x384xf32, #tpu.memory_space<vmem>>, %arg4: memref<2x8x32xf32, #tpu.memory_space<vmem>>) attributes {dimension_semantics = [#tpu.dimension_semantics<parallel>], iteration_bounds = array<i64: 1>, scalar_prefetch = 0 : i64, scratch_operands = 0 : i64, tpu.core_type = #tpu.core_type<tc>, window_params = [{transform_indices = @transform_0, window_bounds = array<i64: 16, 16>}, {pipeline_mode = #tpu.pipeline_mode<synchronous>, transform_indices = @transform_1, window_bounds = array<i64: 16, 384>}, {pipeline_mode = #tpu.pipeline_mode<synchronous>, transform_indices = @transform_2, window_bounds = array<i64: 1, 384>}, {transform_indices = @transform_3, window_bounds = array<i64: 2, 8, 32>}]} {
    %c0 = arith.constant 0 : index
    %c0_0 = arith.constant 0 : index
    %0 = vector.load %arg1[%c0, %c0_0] : memref<16x16xf32, #tpu.memory_space<vmem>>, vector<16x16xf32>
    %1 = arith.truncf %0 : vector<16x16xf32> to vector<16x16xbf16>
    %c0_1 = arith.constant 0 : index
    %c0_2 = arith.constant 0 : index
    %2 = vector.load %arg2[%c0_1, %c0_2] : memref<16x384xbf16, #tpu.memory_space<vmem>>, vector<16x384xbf16>
    %cst = arith.constant dense<0.000000e+00> : vector<16x384xf32>
    %3 = tpu.matmul %1, %2, %cst {dimension_numbers = #tpu.dot_dimension_numbers<[1], [0], [0], [1], [0, 0, 1, 1], [], []>} : vector<16x16xbf16>, vector<16x384xbf16>, vector<16x384xf32> -> vector<16x384xf32>
    %c0_3 = arith.constant 0 : index
    %c0_4 = arith.constant 0 : index
    %4 = vector.load %arg3[%c0_3, %c0_4] : memref<1x384xf32, #tpu.memory_space<vmem>>, vector<1x384xf32>
    %5 = vector.broadcast %4 : vector<1x384xf32> to vector<16x384xf32>
    %6 = arith.addf %3, %5 : vector<16x384xf32>
    %7 = vector.shape_cast %6 : vector<16x384xf32> to vector<2x8x384xf32>
    %8 = vector.extract_strided_slice %7 {offsets = [0, 0, 0], sizes = [2, 8, 128], strides = [1, 1, 1]} : vector<2x8x384xf32> to vector<2x8x128xf32>
    %9 = arith.truncf %8 : vector<2x8x128xf32> to vector<2x8x128xbf16>
    %10 = vector.extract_strided_slice %7 {offsets = [0, 0, 128], sizes = [2, 8, 128], strides = [1, 1, 1]} : vector<2x8x384xf32> to vector<2x8x128xf32>
    %11 = arith.truncf %10 : vector<2x8x128xf32> to vector<2x8x128xbf16>
    %12 = vector.extract_strided_slice %7 {offsets = [0, 0, 256], sizes = [2, 8, 32], strides = [1, 1, 1]} : vector<2x8x384xf32> to vector<2x8x32xf32>
    %13 = arith.truncf %12 : vector<2x8x32xf32> to vector<2x8x32xbf16>
    "tpu.trace_start"() <{level = 10 : i32, message = "bqd,bkd->bqk"}> : () -> ()
    %cst_5 = arith.constant dense<0.000000e+00> : vector<2x8x8xf32>
    %14 = tpu.matmul %9, %11, %cst_5 {dimension_numbers = #tpu.dot_dimension_numbers<[2], [2], [1], [1], [0, 0, 0, 1, 1, 1], [0], [0]>} : vector<2x8x128xbf16>, vector<2x8x128xbf16>, vector<2x8x8xf32> -> vector<2x8x8xf32>
    "tpu.trace_stop"() : () -> ()
    %cst_6 = arith.constant dense<0xFF800000> : vector<2x8xf32>
    %15 = vector.multi_reduction <maximumf>, %14, %cst_6 [2] : vector<2x8x8xf32> to vector<2x8xf32>
    %16 = vector.shape_cast %15 : vector<2x8xf32> to vector<2x8x1xf32>
    %17 = vector.broadcast %16 : vector<2x8x1xf32> to vector<2x8x8xf32>
    %18 = arith.subf %14, %17 : vector<2x8x8xf32>
    %19 = math.exp %18 : vector<2x8x8xf32>
    %cst_7 = arith.constant dense<0.000000e+00> : vector<2x8xf32>
    %20 = vector.multi_reduction <add>, %19, %cst_7 [2] : vector<2x8x8xf32> to vector<2x8xf32>
    %21 = vector.shape_cast %20 : vector<2x8xf32> to vector<2x8x1xf32>
    %22 = tpu.reciprocal %21 {approx = true} : vector<2x8x1xf32> -> vector<2x8x1xf32>
    %23 = vector.broadcast %22 : vector<2x8x1xf32> to vector<2x8x8xf32>
    %24 = arith.mulf %19, %23 : vector<2x8x8xf32>
    %25 = arith.truncf %24 : vector<2x8x8xf32> to vector<2x8x8xbf16>
    "tpu.trace_start"() <{level = 10 : i32, message = "bqk,bkd->bqd"}> : () -> ()
    %cst_8 = arith.constant dense<0.000000e+00> : vector<2x8x32xf32>
    %26 = tpu.matmul %25, %13, %cst_8 {dimension_numbers = #tpu.dot_dimension_numbers<[2], [1], [1], [2], [0, 0, 0, 1, 1, 2], [0], [0]>} : vector<2x8x8xbf16>, vector<2x8x32xbf16>, vector<2x8x32xf32> -> vector<2x8x32xf32>
    "tpu.trace_stop"() : () -> ()
    %c0_9 = arith.constant 0 : index
    %c0_10 = arith.constant 0 : index
    %c0_11 = arith.constant 0 : index
    %27 = vector.load %arg4[%c0_9, %c0_10, %c0_11] : memref<2x8x32xf32, #tpu.memory_space<vmem>>, vector<2x8x32xf32>
    tpu.vector_store %arg4[%c0_9, %c0_10, %c0_11], %26 {strides = array<i32>} : memref<2x8x32xf32, #tpu.memory_space<vmem>>, vector<2x8x32xf32>,
    return
  }
  func.func @transform_0(%arg0: i32) -> (i32, i32) {
    %c0_i32 = arith.constant 0 : i32
    %c0_i32_0 = arith.constant 0 : i32
    return %arg0, %c0_i32 : i32, i32
  }
  func.func @transform_1(%arg0: i32) -> (i32, i32) {
    %c0_i32 = arith.constant 0 : i32
    %c0_i32_0 = arith.constant 0 : i32
    %c0_i32_1 = arith.constant 0 : i32
    return %c0_i32, %c0_i32_0 : i32, i32
  }
  func.func @transform_2(%arg0: i32) -> (i32, i32) {
    %c0_i32 = arith.constant 0 : i32
    %c0_i32_0 = arith.constant 0 : i32
    %c0_i32_1 = arith.constant 0 : i32
    return %c0_i32, %c0_i32_0 : i32, i32
  }
  func.func @transform_3(%arg0: i32) -> (i32, i32, i32) {
    %c0_i32 = arith.constant 0 : i32
    %c0_i32_0 = arith.constant 0 : i32
    %c0_i32_1 = arith.constant 0 : i32
    return %arg0, %c0_i32, %c0_i32_0 : i32, i32, i32
  }
}

</mosaic_0001>

<bundles_post_ra>
// kernel: tpu_custom_call.1
= control target key start
LH: loop header
LB: loop body
LE: loop exit
PB: predicated region body
PF: predicated region fallthrough
CT: control target
= control target key end

     0   :  { %8 = vsyncpa [#allocation3], 0  ;;  %s624_s0 = inlined_call_operand.hbm [shape: f32[16,16], index: 0, kind: input, shape index: {}]   ;;  %s625_s1 = inlined_call_operand.hbm [shape: bf16[16,384], index: 1, kind: input, shape index: {}]   ;;  %s626_s2 = inlined_call_operand.vmem [shape: f32[1,384], index: 2, kind: input, shape index: {}]   ;;  %s627_s3 = inlined_call_operand.hbm [shape: f32[2,8,32], index: 3, kind: output, shape index: {}]  }
   0x1   :  { %9 = vsyncpa [#allocation6], 0 }
   0x2   :  { %10 = vsyncpa [#allocation4], 0  ;;  %s538_s12 = smov [#allocation2]   ;;  %s466_s16 = scalar_lea.hbm %s624_s0, 256 }
   0x3   :  { %s16_s13 = sshll.u32 %s538_s12, 4  ;;  %p467_p0 = scmp.ne.s32.totalorder %s624_s0, %s466_s16  ;;  %s17_s13 = int_to_ptr.vmem [resolvable:$true] %s16_s13 }
   0x4   :  { %p470_p1 = scmp.lt.u32.totalorder %s466_s16, %s624_s0 }
   0x6   :  { %p472_p2 = pnand %p470_p1, %p467_p0 }
   0x8   :  { %475 = shalt.err (!%p472_p2)
}
   0x9   :  { %s476_s21 = scalar_lea.vmem %s17_s13, 256  ;;  %p481_p4 = scmp.lt.s32.totalorder %s17_s13, %s17_s13 }
   0xa   :  { %p477_p3 = scmp.ne.s32.totalorder %s17_s13, %s476_s21  ;;  %p482_p5 = scmp.lt.s32.totalorder %s476_s21, %s476_s21 }
   0xc   :  { %p483_p6 = por %p482_p5, %p481_p4 }
   0xe   :  { %p484_p7 = pnand %p483_p6, %p477_p3 }
  0x10   :  { %487 = shalt.err (!%p484_p7)
}
  0x11   :  { %s539_s22 = smov 128   ;;  %s540_s23 = smov 8  }
  0x12   :  { %22 = dma.hbm_to_vmem [thread:$0]  %s624_s0, 256, %s17_s13, [#allocation3], %s539_s22, %s539_s22, %s540_s23  }
  0x13   :  { %s541_s26 = smov [#allocation5]   ;;  %s488_s30 = scalar_lea.hbm %s625_s1, 384 }
  0x14   :  { %s28_s27 = sshll.u32 %s541_s26, 4  ;;  %p489_p8 = scmp.ne.s32.totalorder %s625_s1, %s488_s30  ;;  %s29_s27 = int_to_ptr.vmem [resolvable:$true] %s28_s27 }
  0x15   :  { %p492_p9 = scmp.lt.u32.totalorder %s488_s30, %s625_s1 }
  0x17   :  { %p494_p10 = pnand %p492_p9, %p489_p8 }
  0x19   :  { %497 = shalt.err (!%p494_p10)
}
  0x1a   :  { %s498_s8 = scalar_lea.vmem %s29_s27, 384  ;;  %p503_p12 = scmp.lt.s32.totalorder %s29_s27, %s29_s27 }
  0x1b   :  { %p499_p11 = scmp.ne.s32.totalorder %s29_s27, %s498_s8  ;;  %p504_p13 = scmp.lt.s32.totalorder %s498_s8, %s498_s8 }
  0x1d   :  { %p505_p0 = por %p504_p13, %p503_p12 }
  0x1f   :  { %p506_p1 = pnand %p505_p0, %p499_p11 }
  0x21   :  { %509 = shalt.err (!%p506_p1)
}
  0x22   :  { %s542_s0 = smov 192   ;;  %s543_s9 = smov 12  }
  0x23   :  { %34 = dma.hbm_to_vmem [thread:$0]  %s625_s1, 384, %s29_s27, [#allocation6], %s542_s0, %s542_s0, %s543_s9  }
  0x24   :  { %532 = dma.done.wait [#allocation3], 256  }
  0x25   :  { %533 = vsyncadd [#allocation3], 4294967040 }
  0x26   :  { %534 = dma.done.wait [#allocation6], 384  }
  0x27   :  { %535 = vsyncadd [#allocation6], 4294966912  ;;  %v544_v0 = vmov 0   ;;  %v545_v1 = vmov 0.0   ;;  %v454_v2 = vld [vmem:[#allocation5 + $0x4] ss:$12 sps:$4 sm:$0xff]   ;;  %v53_v8 = vlaneseq }
  0x28   :  { %120 = vmatprep.mubr.bf16.mxu0 %v544_v0  ;;  %414 = vmatprep.subr.bf16.mxu1 %v545_v1  ;;  %v456_v3 = vld [vmem:[#allocation5] ss:$12 sps:$4 sm:$0xff]   ;;  %v44_v4 = vld [vmem:[#allocation2] sm:$0xff]  ;;  %v45_v5 = vld [vmem:[#allocation2 + $0x8] sm:$0xff]  ;;  %vm84_vm0 = vcmask 130048   ;;  %vm546_vm1 = vmmov 0  }
  0x29   :  { %88 = vmatprep.subr.bf16.mxu0 %v454_v2  ;;  %v46_v6 = vpack.c.bf16 %v45_v5, %v44_v4  ;;  %v457_v7 = vld [vmem:[#allocation5 + $0x8] ss:$12 sps:$4 sm:$0xff]   ;;  %416 = vmatprep.mubr.msk.bf16.mxu1 %vm546_vm1, %v545_v1  ;;  %v54_v9 = vshrl.u32 %v53_v8, 7  ;;  %v51_v11 = vld [vmem:[%s626_s2] sm:$0x7]  ;;  %vm286_vm2 = vcmask 1043456  }
  0x2a   :  { %89 = vmatpush1.bf16.msra.mxu0 %v456_v3  ;;  %415 = vmatpush3.bf16.msra.mxu1 %v457_v7  ;;  %vm258_vm3 = vcmask 64512   ;;  %vm376_vm4 = vcmask 261120   ;;  %s547_s2 = smov [#allocation7]  }
  0x2b   :  { %420 = vmatprep.subr.bf16.mxu0 %v545_v1  ;;  %426 = vmatprep.subr.bf16.mxu1 %v545_v1  ;;  %v59_v10 = vsub.s32 1, %v54_v9  ;;  %v55_v13 = vsub.s32 0, %v54_v9  ;;  %v63_v27 = vsub.s32 2, %v54_v9  ;;  %s384_s13 = sshll.u32 %s547_s2, 4  ;;  %s385_s13 = int_to_ptr.vmem [resolvable:$true] %s384_s13 }
  0x2c   :  { %s510_s14 = scalar_lea.vmem %s385_s13, 256  ;;  %p515_p3 = scmp.lt.s32.totalorder %s385_s13, %s385_s13 }
  0x2d   :  { %400 = vmatmul.mubr.msk.bf16.vlgmr.msra.gmra.mrb[0].mxu0 %vm84_vm0, %v46_v6  ;;  %417 = vmatmul.mubr.msk.bf16.vlgmr.msra.gmra.mrb[0].mxu1 %vm84_vm0, %v46_v6  ;;  %v60_v12 = vrot.slane %v51_v11, %v59_v10  ;;  %v56_v18 = vrot.slane %v51_v11, %v55_v13  ;;  %v64_v28 = vrot.slane %v51_v11, %v63_v27  ;;  %p511_p2 = scmp.ne.s32.totalorder %s385_s13, %s510_s14  ;;  %p516_p4 = scmp.lt.s32.totalorder %s510_s14, %s510_s14 }
  0x2e   :  { %422 = vmatprep.mubr.msk.bf16.mxu0 %vm546_vm1, %v545_v1  ;;  %428 = vmatprep.mubr.msk.bf16.mxu1 %vm546_vm1, %v545_v1 }
  0x2f   :  { %p517_p5 = por %p516_p4, %p515_p3 }
  0x31   :  { %p518_p6 = pnand %p517_p5, %p511_p2 }
 0x100   :  { %v122_v14 = vpop.f32.mrb[0].mxu0  ;;  %v165_v29 = vpop.f32.mrb[0].mxu1 }
 0x101   :  { %v124_v15 = vpop.f32.mrb[1].mxu0  ;;  %v123_v23 = vadd.f32 %v122_v14, %v56_v18  ;;  %v166_v30 = vadd.f32 %v165_v29, %v64_v28  ;;  %v418_v31 = vpop.f32.mrb[1].mxu1 }
 0x102   :  { %v125_v16 = vadd.f32 %v124_v15, %v60_v12  ;;  %v126_v17 = vpop.f32.mrb[2].mxu0  ;;  %v168_v32 = vpop.f32.mrb[2].mxu1 }
 0x103   :  { %v128_v19 = vpop.f32.mrb[3].mxu0  ;;  %v127_v24 = vadd.f32 %v126_v17, %v56_v18  ;;  %v172_v25 = vpack.c.bf16 %v123_v23, %v123_v23  ;;  %v176_v33 = vpack.c.bf16 %v166_v30, %v166_v30  ;;  %v169_v34 = vadd.f32 %v168_v32, %v64_v28  ;;  %v419_v35 = vpop.f32.mrb[3].mxu1 }
 0x104   :  { %v174_v20 = vpack.c.bf16 %v125_v16, %v125_v16  ;;  %v129_v21 = vadd.f32 %v128_v19, %v60_v12 }
 0x105   :  { %v173_v26 = vpack.c.bf16 %v127_v24, %v127_v24  ;;  %v288_v36 = vsel %vm286_vm2, %v176_v33, 0  ;;  %v177_v37 = vpack.c.bf16 %v169_v34, %v169_v34 }
 0x106   :  { %v175_v22 = vpack.c.bf16 %v129_v21, %v129_v21  ;;  %421 = vmatpush3.bf16.xpose.msra.mxu0 %v174_v20 }
 0x107   :  { %432 = vmatprep.subr.bf16.mxu0 %v545_v1  ;;  %v334_v38 = vsel %vm286_vm2, %v177_v37, 0 }
 0x108   :  { %427 = vmatpush3.bf16.xpose.msra.mxu1 %v175_v22 }
 0x109   :  { %438 = vmatprep.subr.bf16.mxu1 %v545_v1 }
 0x10d   :  { %423 = vmatmul.mubr.bf16.vlgmr.msra.gmra.mrb[4].mxu0 %v172_v25 }
 0x10e   :  { %434 = vmatprep.mubr.msk.bf16.mxu0 %vm546_vm1, %v545_v1  ;;  %433 = vmatpush3.bf16.msra.mxu0 %v288_v36 }
 0x10f   :  { %429 = vmatmul.mubr.bf16.vlgmr.msra.gmra.mrb[4].mxu1 %v173_v26 }
 0x110   :  { %440 = vmatprep.mubr.msk.bf16.mxu1 %vm546_vm1, %v545_v1  ;;  %439 = vmatpush3.bf16.msra.mxu1 %v334_v38 }
 0x1e0   :  { %v212_v39 = vpop.f32.mrb[4].mxu0 }
 0x1e1   :  { %v424_v40 = vpop.f32.mrb[5].mxu0  ;;  %v259_v41 = vsel %vm258_vm3, %v212_v39, -inf }
 0x1e2   :  { %v252_v42 = vpop.f32.mrb[4].mxu1  ;;  %260 = vmax.xlane.f32.xlu0 %v259_v41  ;;  %v215_v43 = vpop.f32.mrb[6].mxu0 }
 0x1e3   :  { %v425_v44 = vpop.f32.mrb[7].mxu0  ;;  %v430_v45 = vpop.f32.mrb[5].mxu1  ;;  %v262_v48 = vsel %vm258_vm3, %v252_v42, -inf }
 0x1e4   :  { %v255_v46 = vpop.f32.mrb[6].mxu1 }
 0x1e5   :  { %v431_v47 = vpop.f32.mrb[7].mxu1 }
 0x1e6   :  { %263 = vmax.xlane.f32.xlu0 %v262_v48 }
 0x26f   :  { %v261_v49 = vpop.xlane.xlu0 %260 }
 0x270   :  { %v265_v50 = vsub.f32 %v212_v39, %v261_v49 }
 0x272   :  { %v267_v51 = vmul.f32 1.442695, %v265_v50 }
 0x273   :  { %v264_v52 = vpop.xlane.xlu0 %263 }
 0x274   :  { %458 = vpow2.f32 %v267_v51  ;;  %v266_v53 = vsub.f32 %v252_v42, %v264_v52 }
 0x276   :  { %v269_v54 = vmul.f32 1.442695, %v266_v53 }
 0x278   :  { %460 = vpow2.f32 %v269_v54 }
 0x27e   :  { %v459_v55 = vpop.eup %458 }
 0x27f   :  { %v271_v56 = vsel %vm258_vm3, %v459_v55, 0.0 }
 0x280   :  { %272 = vadd.xlane.f32.xlu1 %v271_v56 }
 0x282   :  { %v461_v57 = vpop.eup %460 }
 0x283   :  { %v274_v58 = vsel %vm258_vm3, %v461_v57, 0.0 }
 0x284   :  { %275 = vadd.xlane.f32.xlu1 %v274_v58 }
 0x30d   :  { %v273_v59 = vpop.xlane.xlu1 %272 }
 0x30e   :  { %462 = vrcp.f32 %v273_v59 }
 0x311   :  { %v276_v60 = vpop.xlane.xlu1 %275 }
 0x312   :  { %464 = vrcp.f32 %v276_v60 }
 0x318   :  { %v463_v61 = vpop.eup %462 }
 0x319   :  { %v279_v62 = vmul.f32 %v463_v61, %v459_v55 }
 0x31b   :  { %v281_v63 = vpack.c.bf16 %v279_v62, %v279_v62 }
 0x31c   :  { %v465_v0 = vpop.eup %464 }
 0x31d   :  { %v280_v1 = vmul.f32 %v465_v0, %v461_v57  ;;  %435 = vmatmul.mubr.msk.bf16.vlgmr.msra.gmra.mrb[8].mxu0 %vm258_vm3, %v281_v63 }
 0x31f   :  { %v282_v2 = vpack.c.bf16 %v280_v1, %v280_v1 }
 0x321   :  { %441 = vmatmul.mubr.msk.bf16.vlgmr.msra.gmra.mrb[8].mxu1 %vm258_vm3, %v282_v2 }
 0x3f0   :  { %v324_v3 = vpop.f32.mrb[8].mxu0 }
 0x3f1   :  { %377 = vst.msk [vmem:[#allocation7] sm:$0xff] %vm376_vm4, %v324_v3  ;;  %v436_v4 = vpop.f32.mrb[9].mxu0 }
 0x3f2   :  { %v327_v5 = vpop.f32.mrb[10].mxu0 }
 0x3f3   :  { %v437_v6 = vpop.f32.mrb[11].mxu0 }
 0x3f4   :  { %v370_v7 = vpop.f32.mrb[8].mxu1 }
 0x3f5   :  { %378 = vst.msk [vmem:[#allocation7 + $0x8] sm:$0xff] %vm376_vm4, %v370_v7  ;;  %v442_v8 = vpop.f32.mrb[9].mxu1 }
 0x3f6   :  { %v373_v9 = vpop.f32.mrb[10].mxu1 }
 0x3f7   :  { %521 = shalt.err (!%p518_p6)
}
 0x3f8   :  { %s522_s17 = scalar_lea.hbm %s627_s3, 256 }
 0x3f9   :  { %p523_p7 = scmp.ne.s32.totalorder %s627_s3, %s522_s17  ;;  %p526_p8 = scmp.lt.u32.totalorder %s522_s17, %s627_s3 }
 0x3fb   :  { %p528_p9 = pnand %p526_p8, %p523_p7 }
 0x3fd   :  { %531 = shalt.err (!%p528_p9)
}
 0x3fe   :  { %390 = dma.vmem_to_hbm [thread:$0]  %s385_s13, 256, %s627_s3, [#allocation4], %s539_s22, %s539_s22, %s540_s23   ;;  %v443_v10 = vpop.f32.mrb[11].mxu1 }
 0x3ff   :  { %536 = dma.done.wait [#allocation4], 256  }
 0x400   :  { %537 = vsyncadd [#allocation4], 4294967040 }
 0x401   :  { %394 = vsyncpa [#allocation3], 1 }
 0x402   :  { %395 = vsyncpa [#allocation6], 1 }
 0x403   :  { %396 = vsyncpa [#allocation4], 1 }

</bundles_post_ra>
